<compile_context>
chip_gen: v7x
topology: tpu7x:2x2x1
jax: 0.10.0
libtpu: 0.0.40
codegen_flags: <defaults>
</compile_context>

<pallas_src>
import jax
import jax.numpy as jnp
from jax.experimental import pallas as pl
from jax.experimental.pallas import tpu as pltpu


def _ds_loss_kernel(disp_ref, img_ref, out_ref):
    d = disp_ref[...].astype(jnp.float32)   # (block_bc, H, W)
    im = img_ref[...].astype(jnp.float32)   # (block_bc, H, W)

    # Horizontal gradients: a[.., w] - a[.., w+1]; the replicate-padded last
    # column is exactly 0, so only the first W-1 columns contribute.
    gx_d = d[:, :, :-1] - d[:, :, 1:]
    gx_i = im[:, :, :-1] - im[:, :, 1:]
    sx = jnp.abs(gx_d) * jnp.exp(-jnp.abs(gx_i))

    # Vertical gradients: a[.., h, :] - a[.., h+1, :]; last row is 0 likewise.
    gy_d = d[:, :-1, :] - d[:, 1:, :]
    gy_i = im[:, :-1, :] - im[:, 1:, :]
    sy = jnp.abs(gy_d) * jnp.exp(-jnp.abs(gy_i))

    # One partial sum per grid step (independent SMEM slot -> no carried
    # accumulator, grid axis stays "parallel").
    out_ref[0, 0] = jnp.sum(sx) + jnp.sum(sy)


def ds_loss(disp, img, *, target_block_bytes=2 * 1024 * 1024):
    """Pallas implementation of DS_Loss.forward. Returns a scalar f32."""
    # Match PyTorch broadcasting (e.g. disp (B,1,H,W) vs img (B,3,H,W)).
    disp, img = jnp.broadcast_arrays(disp, img)
    b, c, h, w = disp.shape
    bc = b * c
    n_total = b * c * h * w

    # Free, contiguous reshapes — no pad, no dtype upcast in the wrapper.
    disp3 = disp.reshape(bc, h, w)
    img3 = img.reshape(bc, h, w)

    # Largest divisor of bc such that one input block stays <= ~2 MiB (f32),
    # i.e. <= ~8 MiB total with 2 inputs double-buffered: fits comfortably in
    # scoped VMEM on v5e/v6e/v7x.
    max_planes = max(1, target_block_bytes // (h * w * 4))
    block_bc = 1
    for cand in range(1, bc + 1):
        if bc % cand == 0 and cand <= max_planes:
            block_bc = cand
    num_blocks = bc // block_bc

    partials = pl.pallas_call(
        _ds_loss_kernel,
        out_shape=jax.ShapeDtypeStruct((num_blocks, 1), jnp.float32),
        grid_spec=pltpu.PrefetchScalarGridSpec(
            num_scalar_prefetch=0,
            grid=(num_blocks,),
            in_specs=[
                pl.BlockSpec((block_bc, h, w), lambda i: (i, 0, 0)),
                pl.BlockSpec((block_bc, h, w), lambda i: (i, 0, 0)),
            ],
            out_specs=pl.BlockSpec(
                (1, 1), lambda i: (i, 0),
                memory_space=pltpu.MemorySpace.SMEM,
            ),
        ),
        compiler_params=pltpu.CompilerParams(
            dimension_semantics=("parallel",)
        ),
    )(disp3, img3)

    # Tiny tree-sum of per-block partials, then the mean over ALL elements
    # (padded gradient rows/cols contribute 0 but count in the denominator).
    return jnp.sum(partials) / jnp.float32(n_total)


def ds_loss_ref(disp, img):
    """Pure-JAX reference mirroring the PyTorch module."""
    disp = disp.astype(jnp.float32)
    img = img.astype(jnp.float32)

    def grad_x(a):
        pad = jnp.concatenate([a, a[:, :, :, -1:]], axis=3)  # replicate right
        return pad[:, :, :, :-1] - pad[:, :, :, 1:]

    def grad_y(a):
        pad = jnp.concatenate([a, a[:, :, -1:, :]], axis=2)  # replicate bottom
        return pad[:, :, :-1, :] - pad[:, :, 1:, :]

    sx = jnp.abs(grad_x(disp)) * jnp.exp(-jnp.abs(grad_x(img)))
    sy = jnp.abs(grad_y(disp)) * jnp.exp(-jnp.abs(grad_y(img)))
    return jnp.mean(sx + sy)


if __name__ == "__main__":
    key = jax.random.PRNGKey(0)
    k1, k2 = jax.random.split(key)
    # Small NCHW disparity map + image, same layout the module expects.
    disp = jax.random.normal(k1, (2, 4, 16, 16), dtype=jnp.float32)
    img = jax.random.normal(k2, (2, 4, 16, 16), dtype=jnp.float32)

    out = ds_loss(disp, img)
    jax.block_until_ready(out)

    ref = ds_loss_ref(disp, img)
    assert jnp.allclose(out, ref, atol=1e-6, rtol=1e-5), (out, ref)
    print("KERNEL_OK")
</pallas_src>

<mosaic_0001>
module attributes {stable_mosaic.version = 11 : i64} {
  func.func @_ds_loss_kernel(%arg0: i32, %arg1: memref<8x16x16xf32, #tpu.memory_space<vmem>>, %arg2: memref<8x16x16xf32, #tpu.memory_space<vmem>>, %arg3: memref<1x1xf32, #tpu.memory_space<smem>>) attributes {dimension_semantics = [#tpu.dimension_semantics<parallel>], iteration_bounds = array<i64: 1>, scalar_prefetch = 0 : i64, scratch_operands = 0 : i64, tpu.core_type = #tpu.core_type<tc>, window_params = [{transform_indices = @transform_0, window_bounds = array<i64: 8, 16, 16>}, {transform_indices = @transform_1, window_bounds = array<i64: 8, 16, 16>}, {transform_indices = @transform_2, window_bounds = array<i64: 1, 1>}]} {
    %c0 = arith.constant 0 : index
    %c0_0 = arith.constant 0 : index
    %c0_1 = arith.constant 0 : index
    %0 = vector.load %arg1[%c0, %c0_0, %c0_1] : memref<8x16x16xf32, #tpu.memory_space<vmem>>, vector<8x16x16xf32>
    %c0_2 = arith.constant 0 : index
    %c0_3 = arith.constant 0 : index
    %c0_4 = arith.constant 0 : index
    %1 = vector.load %arg2[%c0_2, %c0_3, %c0_4] : memref<8x16x16xf32, #tpu.memory_space<vmem>>, vector<8x16x16xf32>
    %2 = vector.extract_strided_slice %0 {offsets = [0, 0, 0], sizes = [8, 16, 15], strides = [1, 1, 1]} : vector<8x16x16xf32> to vector<8x16x15xf32>
    %3 = vector.extract_strided_slice %0 {offsets = [0, 0, 1], sizes = [8, 16, 15], strides = [1, 1, 1]} : vector<8x16x16xf32> to vector<8x16x15xf32>
    %4 = arith.subf %2, %3 : vector<8x16x15xf32>
    %5 = vector.extract_strided_slice %1 {offsets = [0, 0, 0], sizes = [8, 16, 15], strides = [1, 1, 1]} : vector<8x16x16xf32> to vector<8x16x15xf32>
    %6 = vector.extract_strided_slice %1 {offsets = [0, 0, 1], sizes = [8, 16, 15], strides = [1, 1, 1]} : vector<8x16x16xf32> to vector<8x16x15xf32>
    %7 = arith.subf %5, %6 : vector<8x16x15xf32>
    %8 = math.absf %4 : vector<8x16x15xf32>
    %9 = math.absf %7 : vector<8x16x15xf32>
    %cst = arith.constant 0.000000e+00 : f32
    %10 = vector.broadcast %cst : f32 to vector<8x16x15xf32>
    %11 = arith.subf %10, %9 : vector<8x16x15xf32>
    %12 = math.exp %11 : vector<8x16x15xf32>
    %13 = arith.mulf %8, %12 : vector<8x16x15xf32>
    %14 = vector.extract_strided_slice %0 {offsets = [0, 0, 0], sizes = [8, 15, 16], strides = [1, 1, 1]} : vector<8x16x16xf32> to vector<8x15x16xf32>
    %15 = vector.extract_strided_slice %0 {offsets = [0, 1, 0], sizes = [8, 15, 16], strides = [1, 1, 1]} : vector<8x16x16xf32> to vector<8x15x16xf32>
    %16 = arith.subf %14, %15 : vector<8x15x16xf32>
    %17 = vector.extract_strided_slice %1 {offsets = [0, 0, 0], sizes = [8, 15, 16], strides = [1, 1, 1]} : vector<8x16x16xf32> to vector<8x15x16xf32>
    %18 = vector.extract_strided_slice %1 {offsets = [0, 1, 0], sizes = [8, 15, 16], strides = [1, 1, 1]} : vector<8x16x16xf32> to vector<8x15x16xf32>
    %19 = arith.subf %17, %18 : vector<8x15x16xf32>
    %20 = math.absf %16 : vector<8x15x16xf32>
    %21 = math.absf %19 : vector<8x15x16xf32>
    %cst_5 = arith.constant 0.000000e+00 : f32
    %22 = vector.broadcast %cst_5 : f32 to vector<8x15x16xf32>
    %23 = arith.subf %22, %21 : vector<8x15x16xf32>
    %24 = math.exp %23 : vector<8x15x16xf32>
    %25 = arith.mulf %20, %24 : vector<8x15x16xf32>
    %26 = vector.shape_cast %13 : vector<8x16x15xf32> to vector<1x8x16x15xf32>
    %cst_6 = arith.constant dense<0.000000e+00> : vector<1xf32>
    %27 = vector.multi_reduction <add>, %26, %cst_6 [1, 2, 3] : vector<1x8x16x15xf32> to vector<1xf32>
    %28 = vector.shape_cast %27 : vector<1xf32> to vector<1x1x1x1xf32>
    %29 = vector.extract %28[0, 0, 0, 0] : f32 from vector<1x1x1x1xf32>
    %30 = vector.shape_cast %25 : vector<8x15x16xf32> to vector<1x8x15x16xf32>
    %cst_7 = arith.constant dense<0.000000e+00> : vector<1xf32>
    %31 = vector.multi_reduction <add>, %30, %cst_7 [1, 2, 3] : vector<1x8x15x16xf32> to vector<1xf32>
    %32 = vector.shape_cast %31 : vector<1xf32> to vector<1x1x1x1xf32>
    %33 = vector.extract %32[0, 0, 0, 0] : f32 from vector<1x1x1x1xf32>
    %34 = arith.addf %29, %33 : f32
    %c0_8 = arith.constant 0 : index
    %c0_9 = arith.constant 0 : index
    %35 = memref.load %arg3[%c0_8, %c0_9] : memref<1x1xf32, #tpu.memory_space<smem>>
    memref.store %34, %arg3[%c0_8, %c0_9] : memref<1x1xf32, #tpu.memory_space<smem>>
    return
  }
  func.func @transform_0(%arg0: i32) -> (i32, i32, i32) {
    %c0_i32 = arith.constant 0 : i32
    %c0_i32_0 = arith.constant 0 : i32
    %c0_i32_1 = arith.constant 0 : i32
    return %arg0, %c0_i32, %c0_i32_0 : i32, i32, i32
  }
  func.func @transform_1(%arg0: i32) -> (i32, i32, i32) {
    %c0_i32 = arith.constant 0 : i32
    %c0_i32_0 = arith.constant 0 : i32
    %c0_i32_1 = arith.constant 0 : i32
    return %arg0, %c0_i32, %c0_i32_0 : i32, i32, i32
  }
  func.func @transform_2(%arg0: i32) -> (i32, i32) {
    %c0_i32 = arith.constant 0 : i32
    %c0_i32_0 = arith.constant 0 : i32
    return %arg0, %c0_i32 : i32, i32
  }
}

</mosaic_0001>

<bundles_post_ra>
// kernel: tpu_custom_call.1
= control target key start
LH: loop header
LB: loop body
LE: loop exit
PB: predicated region body
PF: predicated region fallthrough
CT: control target
= control target key end

     0   :  { %7 = vsyncpa [#allocation3], 0  ;;  %s1101_s0 = inlined_call_operand.hbm [shape: f32[8,16,16], index: 0, kind: input, shape index: {}]   ;;  %s1102_s1 = inlined_call_operand.hbm [shape: f32[8,16,16], index: 1, kind: input, shape index: {}]   ;;  %s1103_s2 = inlined_call_operand.hbm [shape: f32[1,1], index: 2, kind: output, shape index: {}]  }
   0x1   :  { %8 = vsyncpa [#allocation6], 0 }
   0x2   :  { %9 = vsyncpa [#allocation4], 0  ;;  %s772_s9 = smov [#allocation2]   ;;  %s712_s13 = scalar_lea.hbm %s1101_s0, 2048 }
   0x3   :  { %s15_s10 = sshll.u32 %s772_s9, 4  ;;  %p713_p0 = scmp.ne.s32.totalorder %s1101_s0, %s712_s13  ;;  %s16_s10 = int_to_ptr.vmem [resolvable:$true] %s15_s10 }
   0x4   :  { %p716_p1 = scmp.lt.u32.totalorder %s712_s13, %s1101_s0 }
   0x6   :  { %p718_p2 = pnand %p716_p1, %p713_p0 }
   0x8   :  { %721 = shalt.err (!%p718_p2)
}
   0x9   :  { %s722_s18 = scalar_lea.vmem %s16_s10, 2048  ;;  %p727_p4 = scmp.lt.s32.totalorder %s16_s10, %s16_s10 }
   0xa   :  { %p723_p3 = scmp.ne.s32.totalorder %s16_s10, %s722_s18  ;;  %p728_p5 = scmp.lt.s32.totalorder %s722_s18, %s722_s18 }
   0xc   :  { %p729_p6 = por %p728_p5, %p727_p4 }
   0xe   :  { %p730_p7 = pnand %p729_p6, %p723_p3 }
  0x10   :  { %733 = shalt.err (!%p730_p7)
}
  0x11   :  { %s773_s19 = smov 128   ;;  %s774_s20 = smov 8  }
  0x12   :  { %21 = dma.hbm_to_vmem [thread:$0]  %s1101_s0, 2048, %s16_s10, [#allocation3], %s773_s19, %s773_s19, %s774_s20  }
  0x13   :  { %s775_s23 = smov [#allocation5]   ;;  %s734_s27 = scalar_lea.hbm %s1102_s1, 2048 }
  0x14   :  { %s27_s24 = sshll.u32 %s775_s23, 4  ;;  %p735_p8 = scmp.ne.s32.totalorder %s1102_s1, %s734_s27  ;;  %s28_s24 = int_to_ptr.vmem [resolvable:$true] %s27_s24 }
  0x15   :  { %p738_p9 = scmp.lt.u32.totalorder %s734_s27, %s1102_s1 }
  0x17   :  { %p740_p10 = pnand %p738_p9, %p735_p8 }
  0x19   :  { %743 = shalt.err (!%p740_p10)
}
  0x1a   :  { %s744_s4 = scalar_lea.vmem %s28_s24, 2048  ;;  %p749_p12 = scmp.lt.s32.totalorder %s28_s24, %s28_s24 }
  0x1b   :  { %p745_p11 = scmp.ne.s32.totalorder %s28_s24, %s744_s4  ;;  %p750_p13 = scmp.lt.s32.totalorder %s744_s4, %s744_s4 }
  0x1d   :  { %p751_p0 = por %p750_p13, %p749_p12 }
  0x1f   :  { %p752_p1 = pnand %p751_p0, %p745_p11 }
  0x21   :  { %755 = shalt.err (!%p752_p1)
}
  0x22   :  { %33 = dma.hbm_to_vmem [thread:$0]  %s1102_s1, 2048, %s28_s24, [#allocation6], %s773_s19, %s773_s19, %s774_s20  }
  0x23   :  { %766 = dma.done.wait [#allocation3], 2048  }
  0x24   :  { %767 = vsyncadd [#allocation3], 4294965248 }
  0x25   :  { %768 = dma.done.wait [#allocation6], 2048  }
  0x26   :  { %769 = vsyncadd [#allocation6], 4294965248  ;;  %v817_v0 = vld [vmem:[#allocation5 + $0x10] sm:$0xff]  ;;  %v819_v1 = vld [vmem:[#allocation5] sm:$0xff]  ;;  %s776_s6 = smov 127   ;;  %vm328_vm0 = vcmask 1046528  }
  0x27   :  { %v821_v2 = vld [vmem:[#allocation5 + $0x18] sm:$0xff]  ;;  %172 = vrot.lane.b32.xlu1 %v817_v0, %s776_s6  ;;  %v388_v3 = vrot.slane %v817_v0, 1  ;;  %168 = vrot.lane.b32.xlu0 %v819_v1, %s776_s6  ;;  %v385_v4 = vrot.slane %v819_v1, 1  ;;  %v830_v6 = vld [vmem:[#allocation5 + $0x8] sm:$0xff]  ;;  %v844_v14 = vld [vmem:[#allocation5 + $0x20] sm:$0xff]  ;;  %vm578_vm1 = vcmask 130048  }
  0x28   :  { %v389_v5 = vrot.slane %v821_v2, 1  ;;  %v386_v7 = vrot.slane %v830_v6, 1  ;;  %v842_v13 = vld [vmem:[#allocation5 + $0x28] sm:$0xff]  ;;  %v391_v17 = vrot.slane %v844_v14, 1  ;;  %v854_v24 = vld [vmem:[#allocation5 + $0x38] sm:$0xff]  ;;  %v856_v25 = vld [vmem:[#allocation5 + $0x30] sm:$0xff] }
  0x29   :  { %v392_v16 = vrot.slane %v842_v13, 1  ;;  %v395_v28 = vrot.slane %v854_v24, 1  ;;  %v394_v32 = vrot.slane %v856_v25, 1  ;;  %v865_v33 = vld [vmem:[#allocation5 + $0x40] sm:$0xff]  ;;  %v869_v35 = vld [vmem:[#allocation2 + $0x8] sm:$0xff]  ;;  %v881_v44 = vld [vmem:[#allocation2 + $0x10] sm:$0xff] }
  0x2a   :  { %v390_v8 = vsel %vm328_vm0, %v388_v3, %v389_v5  ;;  %v426_v9 = vsub.f32 %v830_v6, %v386_v7  ;;  %v387_v10 = vsel %vm328_vm0, %v385_v4, %v386_v7  ;;  %v428_v19 = vsub.f32 %v821_v2, %v389_v5  ;;  %v867_v34 = vld [vmem:[#allocation2] sm:$0xff]  ;;  %v879_v43 = vld [vmem:[#allocation5 + $0x48] sm:$0xff]  ;;  %v883_v45 = vld [vmem:[#allocation2 + $0x18] sm:$0xff]  ;;  %s756_s11 = scalar_lea.hbm %s1103_s2, 16 }
  0x2b   :  { %174 = vrot.lane.b32.xlu1 %v821_v2, %s776_s6  ;;  %v427_v11 = vsub.f32 %v817_v0, %v390_v8  ;;  %170 = vrot.lane.b32.xlu0 %v830_v6, %s776_s6  ;;  %v425_v12 = vsub.f32 %v819_v1, %v387_v10  ;;  %v393_v23 = vsel %vm328_vm0, %v391_v17, %v392_v16  ;;  %v329_v36 = vrot.slane %v867_v34, 1  ;;  %v897_v57 = vld [vmem:[#allocation5 + $0x50] sm:$0xff]  ;;  %v906_v3 = vld [vmem:[#allocation5 + $0x58] sm:$0xff]  ;;  %v911_v10 = vld [vmem:[#allocation2 + $0x28] sm:$0xff]  ;;  %p757_p2 = scmp.ne.s32.totalorder %s1103_s2, %s756_s11  ;;  %p760_p3 = scmp.lt.u32.totalorder %s756_s11, %s1103_s2 }
  0x2c   :  { %v458_v15 = vand.u32 2147483647, %v426_v9  ;;  %v460_v26 = vand.u32 2147483647, %v428_v19  ;;  %v429_v31 = vsub.f32 %v844_v14, %v393_v23  ;;  %v330_v37 = vrot.slane %v869_v35, 1  ;;  %v909_v9 = vld [vmem:[#allocation2 + $0x20] sm:$0xff] }
  0x2d   :  { %v457_v18 = vand.u32 2147483647, %v425_v12  ;;  %v459_v21 = vand.u32 2147483647, %v427_v11  ;;  %v430_v39 = vsub.f32 %v842_v13, %v392_v16  ;;  %v396_v42 = vsel %vm328_vm0, %v394_v32, %v395_v28  ;;  %p762_p4 = pnand %p760_p3, %p757_p2 }
  0x2e   :  { %v474_v20 = vsub.f32 0.0, %v458_v15  ;;  %v476_v38 = vsub.f32 0.0, %v460_v26  ;;  %v461_v41 = vand.u32 2147483647, %v429_v31  ;;  %v331_v46 = vsel %vm328_vm0, %v329_v36, %v330_v37 }
  0x2f   :  { %v473_v22 = vsub.f32 0.0, %v457_v18  ;;  %178 = vrot.lane.b32.xlu1 %v842_v13, %s776_s6  ;;  %176 = vrot.lane.b32.xlu0 %v844_v14, %s776_s6  ;;  %v475_v29 = vsub.f32 0.0, %v459_v21  ;;  %v332_v47 = vrot.slane %v881_v44, 1  ;;  %v333_v48 = vrot.slane %v883_v45, 1 }
  0x30   :  { %v491_v27 = vmul.f32 1.442695, %v474_v20  ;;  %v495_v49 = vmul.f32 1.442695, %v476_v38  ;;  %v462_v50 = vand.u32 2147483647, %v430_v39  ;;  %v431_v51 = vsub.f32 %v856_v25, %v396_v42 }
  0x31   :  { %v489_v30 = vmul.f32 1.442695, %v473_v22  ;;  %v493_v40 = vmul.f32 1.442695, %v475_v29  ;;  %v477_v52 = vsub.f32 0.0, %v461_v41  ;;  %v397_v53 = vrot.slane %v865_v33, 1 }
  0x32   :  { %648 = vpow2.f32 %v491_v27  ;;  %v398_v54 = vrot.slane %v879_v43, 1  ;;  %v369_v55 = vsub.f32 %v867_v34, %v331_v46  ;;  %v370_v56 = vsub.f32 %v869_v35, %v330_v37 }
  0x33   :  { %182 = vrot.lane.b32.xlu1 %v854_v24, %s776_s6  ;;  %180 = vrot.lane.b32.xlu0 %v856_v25, %s776_s6  ;;  %650 = vpow2.f32 %v489_v30  ;;  %v334_v58 = vsel %vm328_vm0, %v332_v47, %v333_v48  ;;  %v478_v59 = vsub.f32 0.0, %v462_v50  ;;  %v432_v60 = vsub.f32 %v854_v24, %v395_v28  ;;  %v923_v28 = vld [vmem:[#allocation5 + $0x60] sm:$0xff]  ;;  %v935_v47 = vld [vmem:[#allocation5 + $0x68] sm:$0xff] }
  0x34   :  { %652 = vpow2.f32 %v493_v40  ;;  %v463_v61 = vand.u32 2147483647, %v431_v51  ;;  %v497_v62 = vmul.f32 1.442695, %v477_v52  ;;  %v399_v63 = vsel %vm328_vm0, %v397_v53, %v398_v54 }
  0x35   :  { %654 = vpow2.f32 %v495_v49  ;;  %v441_v5 = vand.u32 2147483647, %v369_v55  ;;  %v442_v7 = vand.u32 2147483647, %v370_v56  ;;  %v371_v8 = vsub.f32 %v881_v44, %v334_v58  ;;  %v939_v49 = vld [vmem:[#allocation2 + $0x38] sm:$0xff] }
  0x36   :  { %v335_v12 = vrot.slane %v909_v9, 1  ;;  %v336_v15 = vrot.slane %v911_v10, 1  ;;  %v499_v16 = vmul.f32 1.442695, %v478_v59  ;;  %v464_v17 = vand.u32 2147483647, %v432_v60 }
  0x37   :  { %184 = vrot.lane.b32.xlu0 %v865_v33, %s776_s6  ;;  %88 = vrot.lane.b32.xlu1 %v867_v34, %s776_s6  ;;  %v479_v18 = vsub.f32 0.0, %v463_v61  ;;  %v433_v19 = vsub.f32 %v865_v33, %v399_v63  ;;  %656 = vpow2.f32 %v497_v62  ;;  %v400_v20 = vrot.slane %v897_v57, 1 }
  0x38   :  { %v372_v21 = vsub.f32 %v883_v45, %v333_v48  ;;  %v401_v22 = vrot.slane %v906_v3, 1  ;;  %v443_v27 = vand.u32 2147483647, %v371_v8  ;;  %vm580_vm2 = vcmask 129024   ;;  %v937_v48 = vld [vmem:[#allocation2 + $0x30] sm:$0xff] }
  0x39   :  { %v337_v30 = vsel %vm328_vm0, %v335_v12, %v336_v15  ;;  %658 = vpow2.f32 %v499_v16  ;;  %v480_v31 = vsub.f32 0.0, %v464_v17  ;;  %v434_v32 = vsub.f32 %v879_v43, %v398_v54 }
  0x3a   :  { %v465_v36 = vand.u32 2147483647, %v433_v19  ;;  %v501_v37 = vmul.f32 1.442695, %v479_v18  ;;  %v444_v38 = vand.u32 2147483647, %v372_v21  ;;  %v402_v39 = vsel %vm328_vm0, %v400_v20, %v401_v22 }
  0x3b   :  { %90 = vrot.lane.b32.xlu0 %v869_v35, %s776_s6  ;;  %186 = vrot.lane.b32.xlu1 %v879_v43, %s776_s6  ;;  %v373_v46 = vsub.f32 %v909_v9, %v337_v30  ;;  %v338_v51 = vrot.slane %v937_v48, 1  ;;  %v339_v52 = vrot.slane %v939_v49, 1  ;;  %v503_v53 = vmul.f32 1.442695, %v480_v31 }
  0x3c   :  { %v649_v4 = vpop.eup %648  ;;  %v466_v54 = vand.u32 2147483647, %v434_v32  ;;  %v481_v55 = vsub.f32 0.0, %v465_v36  ;;  %v435_v56 = vsub.f32 %v897_v57, %v402_v39  ;;  %660 = vpow2.f32 %v501_v37 }
  0x3d   :  { %v651_v11 = vpop.eup %650  ;;  %v522_v26 = vmul.f32 %v649_v4, %v442_v7  ;;  %v403_v59 = vrot.slane %v923_v28, 1  ;;  %v374_v60 = vsub.f32 %v911_v10, %v336_v15  ;;  %v445_v63 = vand.u32 2147483647, %v373_v46 }
  0x3e   :  { %v521_v23 = vmul.f32 %v651_v11, %v441_v5  ;;  %v653_v29 = vpop.eup %652  ;;  %v404_v4 = vrot.slane %v935_v47, 1  ;;  %v952_v5 = vld [vmem:[#allocation5 + $0x70] sm:$0xff]  ;;  %v340_v8 = vsel %vm328_vm0, %v338_v51, %v339_v52  ;;  %v482_v11 = vsub.f32 0.0, %v466_v54 }
  0x3f   :  { %92 = vrot.lane.b32.xlu0 %v881_v44, %s776_s6  ;;  %188 = vrot.lane.b32.xlu1 %v897_v57, %s776_s6  ;;  %v581_v41 = vsel %vm580_vm2, %v522_v26, 0.0  ;;  %v523_v42 = vmul.f32 %v653_v29, %v443_v27  ;;  %v655_v50 = vpop.eup %654  ;;  %v505_v12 = vmul.f32 1.442695, %v481_v55  ;;  %v436_v15 = vsub.f32 %v906_v3, %v401_v22  ;;  %v963_v27 = vld [vmem:[#allocation5 + $0x78] sm:$0xff]  ;;  %v965_v22 = vld [vmem:[#allocation2 + $0x40] sm:$0xff]  ;;  %v967_v29 = vld [vmem:[#allocation2 + $0x48] sm:$0xff] }
  0x40   :  { %v579_v40 = vsel %vm578_vm1, %v521_v23, 0.0  ;;  %v524_v61 = vmul.f32 %v655_v50, %v444_v38  ;;  %v467_v16 = vand.u32 2147483647, %v435_v56  ;;  %662 = vpow2.f32 %v503_v53 }
  0x41   :  { %v582_v58 = vadd.f32 %v581_v41, %v579_v40  ;;  %v583_v62 = vsel %vm578_vm1, %v523_v42, 0.0  ;;  %v657_v7 = vpop.eup %656  ;;  %v446_v18 = vand.u32 2147483647, %v374_v60  ;;  %v405_v23 = vsel %vm328_vm0, %v403_v59, %v404_v4 }
  0x42   :  { %v585_v20 = vsel %vm580_vm2, %v524_v61, 0.0  ;;  %v525_v21 = vmul.f32 %v657_v7, %v445_v63  ;;  %v375_v26 = vsub.f32 %v937_v48, %v340_v8  ;;  %v341_v30 = vrot.slane %v965_v22, 1  ;;  %v989_v8 = vld [vmem:[#allocation2 + $0x50] sm:$0xff] }
  0x43   :  { %94 = vrot.lane.b32.xlu0 %v883_v45, %s776_s6  ;;  %190 = vrot.lane.b32.xlu1 %v906_v3, %s776_s6  ;;  %v584_v17 = vadd.f32 %v583_v62, %v582_v58  ;;  %v659_v19 = vpop.eup %658  ;;  %v342_v31 = vrot.slane %v967_v29, 1  ;;  %664 = vpow2.f32 %v505_v12  ;;  %v507_v32 = vmul.f32 1.442695, %v482_v11 }
  0x44   :  { %v468_v36 = vand.u32 2147483647, %v436_v15  ;;  %v483_v37 = vsub.f32 0.0, %v467_v16  ;;  %v526_v39 = vmul.f32 %v659_v19, %v446_v18  ;;  %v437_v40 = vsub.f32 %v923_v28, %v405_v23 }
  0x45   :  { %v586_v38 = vadd.f32 %v585_v20, %v584_v17  ;;  %v406_v41 = vrot.slane %v952_v5, 1  ;;  %v587_v42 = vsel %vm578_vm1, %v525_v21, 0.0  ;;  %v376_v46 = vsub.f32 %v939_v49, %v339_v52 }
  0x46   :  { %v447_v50 = vand.u32 2147483647, %v375_v26  ;;  %v407_v51 = vrot.slane %v963_v27, 1  ;;  %v661_v53 = vpop.eup %660  ;;  %v343_v54 = vsel %vm328_vm0, %v341_v30, %v342_v31  ;;  %666 = vpow2.f32 %v507_v32 }
  0x47   :  { %96 = vrot.lane.b32.xlu0 %v909_v9, %s776_s6  ;;  %192 = vrot.lane.b32.xlu1 %v923_v28, %s776_s6  ;;  %v484_v55 = vsub.f32 0.0, %v468_v36  ;;  %v438_v56 = vsub.f32 %v935_v47, %v404_v4  ;;  %v509_v58 = vmul.f32 1.442695, %v483_v37  ;;  %v589_v59 = vsel %vm580_vm2, %v526_v39, 0.0  ;;  %v991_v4 = vld [vmem:[#allocation2 + $0x58] sm:$0xff]  ;;  %v1002_v36 = vld [vmem:[#allocation2 + $0x60] sm:$0xff] }
  0x48   :  { %v588_v60 = vadd.f32 %v587_v42, %v586_v38  ;;  %v469_v61 = vand.u32 2147483647, %v437_v40  ;;  %v448_v52 = vand.u32 2147483647, %v376_v46  ;;  %v527_v62 = vmul.f32 %v661_v53, %v447_v50  ;;  %v1004_v37 = vld [vmem:[#allocation2 + $0x68] sm:$0xff] }
  0x49   :  { %v408_v63 = vsel %vm328_vm0, %v406_v41, %v407_v51  ;;  %v377_v7 = vsub.f32 %v965_v22, %v343_v54  ;;  %v344_v12 = vrot.slane %v989_v8, 1  ;;  %v345_v15 = vrot.slane %v991_v4, 1 }
  0x4a   :  { %v663_v11 = vpop.eup %662  ;;  %v511_v16 = vmul.f32 1.442695, %v484_v55  ;;  %v470_v17 = vand.u32 2147483647, %v438_v56  ;;  %668 = vpow2.f32 %v509_v58  ;;  %v590_v18 = vadd.f32 %v589_v59, %v588_v60  ;;  %v1014_v56 = vld [vmem:[#allocation2 + $0x70] sm:$0xff]  ;;  %v1016_v58 = vld [vmem:[#allocation2 + $0x78] sm:$0xff] }
  0x4b   :  { %98 = vrot.lane.b32.xlu0 %v911_v10, %s776_s6  ;;  %194 = vrot.lane.b32.xlu1 %v935_v47, %s776_s6  ;;  %v485_v19 = vsub.f32 0.0, %v469_v61  ;;  %v439_v20 = vsub.f32 %v952_v5, %v408_v63  ;;  %v528_v23 = vmul.f32 %v663_v11, %v448_v52  ;;  %v591_v26 = vsel %vm578_vm1, %v527_v62, 0.0 }
  0x4c   :  { %v378_v30 = vsub.f32 %v967_v29, %v342_v31  ;;  %v449_v32 = vand.u32 2147483647, %v377_v7  ;;  %v346_v38 = vsel %vm328_vm0, %v344_v12, %v345_v15  ;;  %670 = vpow2.f32 %v511_v16 }
  0x4d   :  { %v665_v21 = vpop.eup %664  ;;  %v486_v39 = vsub.f32 0.0, %v470_v17  ;;  %v513_v40 = vmul.f32 1.442695, %v485_v19  ;;  %v592_v41 = vadd.f32 %v591_v26, %v590_v18  ;;  %v440_v42 = vsub.f32 %v963_v27, %v407_v51 }
  0x4e   :  { %v471_v46 = vand.u32 2147483647, %v439_v20  ;;  %v593_v50 = vsel %vm580_vm2, %v528_v23, 0.0  ;;  %v450_v53 = vand.u32 2147483647, %v378_v30  ;;  %v529_v54 = vmul.f32 %v665_v21, %v449_v32 }
  0x4f   :  { %100 = vrot.lane.b32.xlu0 %v937_v48, %s776_s6  ;;  %196 = vrot.lane.b32.xlu1 %v952_v5, %s776_s6  ;;  %v379_v55 = vsub.f32 %v989_v8, %v346_v38  ;;  %v347_v51 = vrot.slane %v1002_v36, 1  ;;  %v348_v59 = vrot.slane %v1004_v37, 1  ;;  %v515_v60 = vmul.f32 1.442695, %v486_v39 }
  0x50   :  { %v667_v31 = vpop.eup %666  ;;  %672 = vpow2.f32 %v513_v40  ;;  %v594_v61 = vadd.f32 %v593_v50, %v592_v41  ;;  %v472_v52 = vand.u32 2147483647, %v440_v42  ;;  %v487_v62 = vsub.f32 0.0, %v471_v46 }
  0x51   :  { %v530_v63 = vmul.f32 %v667_v31, %v450_v53  ;;  %v595_v7 = vsel %vm578_vm1, %v529_v54, 0.0  ;;  %v380_v11 = vsub.f32 %v991_v4, %v345_v15  ;;  %v451_v12 = vand.u32 2147483647, %v379_v55 }
  0x52   :  { %v349_v17 = vsel %vm328_vm0, %v347_v51, %v348_v59  ;;  %674 = vpow2.f32 %v515_v60  ;;  %v488_v18 = vsub.f32 0.0, %v472_v52  ;;  %v517_v19 = vmul.f32 1.442695, %v487_v62 }
  0x53   :  { %102 = vrot.lane.b32.xlu0 %v939_v49, %s776_s6  ;;  %198 = vrot.lane.b32.xlu1 %v963_v27, %s776_s6  ;;  %v596_v20 = vadd.f32 %v595_v7, %v594_v61  ;;  %v597_v23 = vsel %vm580_vm2, %v530_v63, 0.0  ;;  %v452_v26 = vand.u32 2147483647, %v380_v11  ;;  %v381_v30 = vsub.f32 %v1002_v36, %v349_v17 }
  0x54   :  { %v669_v16 = vpop.eup %668  ;;  %v350_v38 = vrot.slane %v1014_v56, 1  ;;  %v351_v39 = vrot.slane %v1016_v58, 1  ;;  %676 = vpow2.f32 %v517_v19  ;;  %v519_v15 = vmul.f32 1.442695, %v488_v18 }
  0x55   :  { %v531_v32 = vmul.f32 %v669_v16, %v451_v12  ;;  %v598_v40 = vadd.f32 %v597_v23, %v596_v20  ;;  %v382_v42 = vsub.f32 %v1004_v37, %v348_v59  ;;  %v453_v46 = vand.u32 2147483647, %v381_v30 }
  0x56   :  { %v671_v21 = vpop.eup %670  ;;  %v352_v53 = vsel %vm328_vm0, %v350_v38, %v351_v39  ;;  %678 = vpow2.f32 %v519_v15  ;;  %v384_v63 = vsub.f32 %v1016_v58, %v351_v39  ;;  %vm537_vm3 = vcmask 121856  }
  0x57   :  { %104 = vrot.lane.b32.xlu0 %v965_v22, %s776_s6  ;;  %106 = vrot.lane.b32.xlu1 %v967_v29, %s776_s6  ;;  %v532_v41 = vmul.f32 %v671_v21, %v452_v26  ;;  %v599_v31 = vsel %vm578_vm1, %v531_v32, 0.0  ;;  %v454_v55 = vand.u32 2147483647, %v382_v42  ;;  %v383_v51 = vsub.f32 %v1014_v56, %v352_v53 }
  0x58   :  { %v600_v54 = vadd.f32 %v599_v31, %v598_v40  ;;  %v456_v17 = vand.u32 2147483647, %v384_v63 }
  0x59   :  { %v601_v61 = vsel %vm580_vm2, %v532_v41, 0.0  ;;  %v455_v7 = vand.u32 2147483647, %v383_v51 }
  0x5a   :  { %v673_v50 = vpop.eup %672  ;;  %v602_v62 = vadd.f32 %v601_v61, %v600_v54 }
  0x5b   :  { %108 = vrot.lane.b32.xlu0 %v989_v8, %s776_s6  ;;  %110 = vrot.lane.b32.xlu1 %v991_v4, %s776_s6  ;;  %v533_v60 = vmul.f32 %v673_v50, %v453_v46 }
  0x5c   :  { %v675_v52 = vpop.eup %674 }
  0x5d   :  { %v534_v59 = vmul.f32 %v675_v52, %v454_v55  ;;  %v603_v11 = vsel %vm578_vm1, %v533_v60, 0.0 }
  0x5e   :  { %v677_v12 = vpop.eup %676  ;;  %v604_v16 = vadd.f32 %v603_v11, %v602_v62 }
  0x5f   :  { %112 = vrot.lane.b32.xlu0 %v1002_v36, %s776_s6  ;;  %114 = vrot.lane.b32.xlu1 %v1004_v37, %s776_s6  ;;  %v535_v18 = vmul.f32 %v677_v12, %v455_v7  ;;  %v605_v19 = vsel %vm580_vm2, %v534_v59, 0.0 }
  0x60   :  { %v679_v20 = vpop.eup %678  ;;  %v606_v21 = vadd.f32 %v605_v19, %v604_v16 }
  0x61   :  { %v536_v23 = vmul.f32 %v679_v20, %v456_v17  ;;  %v607_v26 = vsel %vm578_vm1, %v535_v18, 0.0 }
  0x62   :  { %v608_v30 = vadd.f32 %v607_v26, %v606_v21 }
  0x63   :  { %116 = vrot.lane.b32.xlu0 %v1014_v56, %s776_s6  ;;  %118 = vrot.lane.b32.xlu1 %v1016_v58, %s776_s6  ;;  %v609_v32 = vsel %vm580_vm2, %v536_v23, 0.0 }
  0x64   :  { %v610_v38 = vadd.f32 %v609_v32, %v608_v30 }
  0x87   :  { %611 = vadd.xlane.f32.xlu1 %v610_v38 }
  0x99   :  { %v173_v39 = vpop.permute.xlu1 %172  ;;  %v169_v15 = vpop.permute.xlu0 %168 }
  0x9a   :  { %v216_v42 = vsub.f32 %v819_v1, %v169_v15  ;;  %v218_v54 = vsub.f32 %v817_v0, %v173_v39 }
  0x9c   :  { %v248_v53 = vand.u32 2147483647, %v216_v42  ;;  %v250_v63 = vand.u32 2147483647, %v218_v54 }
  0x9d   :  { %v175_v40 = vpop.permute.xlu1 %174  ;;  %v171_v41 = vpop.permute.xlu0 %170 }
  0x9e   :  { %v217_v46 = vsub.f32 %v830_v6, %v171_v41  ;;  %v219_v51 = vsub.f32 %v821_v2, %v175_v40  ;;  %v264_v52 = vsub.f32 0.0, %v248_v53  ;;  %v266_v17 = vsub.f32 0.0, %v250_v63 }
  0xa0   :  { %v249_v55 = vand.u32 2147483647, %v217_v46  ;;  %v251_v59 = vand.u32 2147483647, %v219_v51  ;;  %v280_v12 = vmul.f32 1.442695, %v264_v52 }
  0xa1   :  { %v179_v31 = vpop.permute.xlu1 %178  ;;  %v177_v50 = vpop.permute.xlu0 %176 }
  0xa2   :  { %v220_v62 = vsub.f32 %v844_v14, %v177_v50  ;;  %v265_v7 = vsub.f32 0.0, %v249_v55  ;;  %v221_v1 = vsub.f32 %v842_v13, %v179_v31  ;;  %v267_v19 = vsub.f32 0.0, %v251_v59 }
  0xa3   :  { %680 = vpow2.f32 %v280_v12  ;;  %v284_v14 = vmul.f32 1.442695, %v266_v17 }
  0xa4   :  { %v252_v16 = vand.u32 2147483647, %v220_v62  ;;  %v282_v18 = vmul.f32 1.442695, %v265_v7  ;;  %v253_v2 = vand.u32 2147483647, %v221_v1 }
  0xa5   :  { %v183_v60 = vpop.permute.xlu1 %182  ;;  %v181_v61 = vpop.permute.xlu0 %180  ;;  %v286_v13 = vmul.f32 1.442695, %v267_v19 }
  0xa6   :  { %v222_v0 = vsub.f32 %v856_v25, %v181_v61  ;;  %v268_v23 = vsub.f32 0.0, %v252_v16  ;;  %682 = vpow2.f32 %v282_v18  ;;  %v223_v26 = vsub.f32 %v854_v24, %v183_v60 }
  0xa7   :  { %v269_v32 = vsub.f32 0.0, %v253_v2  ;;  %684 = vpow2.f32 %v284_v14 }
  0xa8   :  { %v254_v30 = vand.u32 2147483647, %v222_v0  ;;  %v288_v15 = vmul.f32 1.442695, %v268_v23  ;;  %v255_v25 = vand.u32 2147483647, %v223_v26  ;;  %686 = vpow2.f32 %v286_v13 }
  0xa9   :  { %v185_v11 = vpop.permute.xlu0 %184  ;;  %v89_v6 = vpop.permute.xlu1 %88  ;;  %v290_v50 = vmul.f32 1.442695, %v269_v32 }
  0xaa   :  { %v224_v40 = vsub.f32 %v865_v33, %v185_v11  ;;  %v270_v41 = vsub.f32 0.0, %v254_v30  ;;  %v136_v46 = vsub.f32 %v867_v34, %v89_v6  ;;  %688 = vpow2.f32 %v288_v15 }
  0xab   :  { %v271_v33 = vsub.f32 0.0, %v255_v25  ;;  %690 = vpow2.f32 %v290_v50 }
  0xac   :  { %v256_v55 = vand.u32 2147483647, %v224_v40  ;;  %v292_v60 = vmul.f32 1.442695, %v270_v41  ;;  %v232_v62 = vand.u32 2147483647, %v136_v46 }
  0xad   :  { %v91_v20 = vpop.permute.xlu0 %90  ;;  %v187_v21 = vpop.permute.xlu1 %186  ;;  %v294_v12 = vmul.f32 1.442695, %v271_v33 }
  0xae   :  { %v225_v42 = vsub.f32 %v879_v43, %v187_v21  ;;  %v137_v31 = vsub.f32 %v869_v35, %v91_v20  ;;  %v681_v43 = vpop.eup %680  ;;  %v272_v1 = vsub.f32 0.0, %v256_v55  ;;  %692 = vpow2.f32 %v292_v60 }
  0xaf   :  { %v312_v17 = vmul.f32 %v681_v43, %v232_v62  ;;  %694 = vpow2.f32 %v294_v12 }
  0xb0   :  { %v257_v61 = vand.u32 2147483647, %v225_v42  ;;  %v233_v34 = vand.u32 2147483647, %v137_v31  ;;  %v683_v63 = vpop.eup %682  ;;  %v296_v14 = vmul.f32 1.442695, %v272_v1 }
  0xb1   :  { %v93_v38 = vpop.permute.xlu0 %92  ;;  %v189_v39 = vpop.permute.xlu1 %188 }
  0xb2   :  { %v226_v24 = vsub.f32 %v897_v57, %v189_v39  ;;  %v138_v51 = vsub.f32 %v881_v44, %v93_v38  ;;  %v273_v16 = vsub.f32 0.0, %v257_v61  ;;  %v313_v18 = vmul.f32 %v683_v63, %v233_v34  ;;  %v685_v19 = vpop.eup %684 }
  0xb3   :  { %v687_v30 = vpop.eup %686  ;;  %v538_v39 = vsel %vm537_vm3, %v312_v17, 0.0  ;;  %696 = vpow2.f32 %v296_v14 }
  0xb4   :  { %v258_v7 = vand.u32 2147483647, %v226_v24  ;;  %v234_v11 = vand.u32 2147483647, %v138_v51  ;;  %v298_v13 = vmul.f32 1.442695, %v273_v16  ;;  %v689_v38 = vpop.eup %688 }
  0xb5   :  { %v95_v53 = vpop.permute.xlu0 %94  ;;  %v191_v54 = vpop.permute.xlu1 %190  ;;  %v539_v15 = vsel %vm537_vm3, %v313_v18, 0.0 }
  0xb6   :  { %v227_v52 = vsub.f32 %v906_v3, %v191_v54  ;;  %v139_v35 = vsub.f32 %v883_v45, %v95_v53  ;;  %v274_v45 = vsub.f32 0.0, %v258_v7  ;;  %v314_v26 = vmul.f32 %v685_v19, %v234_v11  ;;  %v691_v54 = vpop.eup %690 }
  0xb7   :  { %v540_v55 = vadd.f32 %v539_v15, %v538_v39  ;;  %698 = vpow2.f32 %v298_v13 }
  0xb8   :  { %v259_v3 = vand.u32 2147483647, %v227_v52  ;;  %v235_v0 = vand.u32 2147483647, %v139_v35  ;;  %v300_v41 = vmul.f32 1.442695, %v274_v45  ;;  %v693_v62 = vpop.eup %692 }
  0xb9   :  { %v97_v57 = vpop.permute.xlu0 %96  ;;  %v193_v59 = vpop.permute.xlu1 %192 }
  0xba   :  { %v140_v6 = vsub.f32 %v909_v9, %v97_v57  ;;  %v228_v44 = vsub.f32 %v923_v28, %v193_v59  ;;  %v275_v32 = vsub.f32 0.0, %v259_v3  ;;  %v315_v40 = vmul.f32 %v687_v30, %v235_v0  ;;  %v695_v16 = vpop.eup %694 }
  0xbb   :  { %700 = vpow2.f32 %v300_v41 }
  0xbc   :  { %v236_v2 = vand.u32 2147483647, %v140_v6  ;;  %v260_v20 = vand.u32 2147483647, %v228_v44  ;;  %v302_v51 = vmul.f32 1.442695, %v275_v32 }
  0xbd   :  { %v99_v21 = vpop.permute.xlu0 %98  ;;  %v195_v23 = vpop.permute.xlu1 %194  ;;  %v543_v60 = vsel %vm537_vm3, %v315_v40, 0.0 }
  0xbe   :  { %v141_v9 = vsub.f32 %v911_v10, %v99_v21  ;;  %v229_v28 = vsub.f32 %v935_v47, %v195_v23  ;;  %v316_v42 = vmul.f32 %v689_v38, %v236_v2  ;;  %v276_v46 = vsub.f32 0.0, %v260_v20  ;;  %v697_v23 = vpop.eup %696 }
  0xbf   :  { %v541_v10 = vsel %vm537_vm3, %v314_v26, 0.0  ;;  %702 = vpow2.f32 %v302_v51 }
  0xc0   :  { %v237_v25 = vand.u32 2147483647, %v141_v9  ;;  %v261_v31 = vand.u32 2147483647, %v229_v28  ;;  %v542_v34 = vadd.f32 %v541_v10, %v540_v55  ;;  %v545_v35 = vsel %vm537_vm3, %v316_v42, 0.0 }
  0xc1   :  { %v101_v50 = vpop.permute.xlu0 %100  ;;  %v197_v24 = vpop.permute.xlu1 %196  ;;  %v304_v63 = vmul.f32 1.442695, %v276_v46 }
  0xc2   :  { %v142_v47 = vsub.f32 %v937_v48, %v101_v50  ;;  %v230_v53 = vsub.f32 %v952_v5, %v197_v24  ;;  %v277_v33 = vsub.f32 0.0, %v261_v31  ;;  %v317_v61 = vmul.f32 %v691_v54, %v237_v25  ;;  %v699_v28 = vpop.eup %698 }
  0xc3   :  { %v544_v11 = vadd.f32 %v543_v60, %v542_v34  ;;  %704 = vpow2.f32 %v304_v63 }
  0xc4   :  { %v238_v52 = vand.u32 2147483647, %v142_v47  ;;  %v262_v43 = vand.u32 2147483647, %v230_v53  ;;  %v306_v6 = vmul.f32 1.442695, %v277_v33 }
  0xc5   :  { %v103_v7 = vpop.permute.xlu0 %102  ;;  %v199_v48 = vpop.permute.xlu1 %198  ;;  %v547_v44 = vsel %vm537_vm3, %v317_v61, 0.0  ;;  %v546_v3 = vadd.f32 %v545_v35, %v544_v11 }
  0xc6   :  { %v318_v57 = vmul.f32 %v693_v62, %v238_v52  ;;  %v278_v5 = vsub.f32 0.0, %v262_v43  ;;  %v143_v59 = vsub.f32 %v939_v49, %v103_v7  ;;  %v231_v1 = vsub.f32 %v963_v27, %v199_v48  ;;  %v701_v40 = vpop.eup %700 }
  0xc7   :  { %v548_v20 = vadd.f32 %v547_v44, %v546_v3  ;;  %706 = vpow2.f32 %v306_v6 }
  0xc8   :  { %v239_v12 = vand.u32 2147483647, %v143_v59  ;;  %v308_v17 = vmul.f32 1.442695, %v278_v5  ;;  %v263_v18 = vand.u32 2147483647, %v231_v1 }
  0xc9   :  { %v105_v0 = vpop.permute.xlu0 %104  ;;  %v107_v19 = vpop.permute.xlu1 %106  ;;  %v549_v45 = vsel %vm537_vm3, %v318_v57, 0.0 }
  0xca   :  { %v319_v2 = vmul.f32 %v695_v16, %v239_v12  ;;  %v144_v49 = vsub.f32 %v965_v22, %v105_v0  ;;  %v145_v27 = vsub.f32 %v967_v29, %v107_v19  ;;  %v279_v21 = vsub.f32 0.0, %v263_v18  ;;  %v703_v31 = vpop.eup %702 }
  0xcb   :  { %v550_v30 = vadd.f32 %v549_v45, %v548_v20  ;;  %708 = vpow2.f32 %v308_v17 }
  0xcc   :  { %v551_v14 = vsel %vm537_vm3, %v319_v2, 0.0  ;;  %v240_v26 = vand.u32 2147483647, %v144_v49  ;;  %v241_v9 = vand.u32 2147483647, %v145_v27 }
  0xcd   :  { %v310_v13 = vmul.f32 1.442695, %v279_v21  ;;  %v109_v32 = vpop.permute.xlu0 %108  ;;  %v111_v38 = vpop.permute.xlu1 %110  ;;  %v552_v25 = vadd.f32 %v551_v14, %v550_v30 }
  0xce   :  { %v320_v39 = vmul.f32 %v697_v23, %v240_v26  ;;  %v321_v15 = vmul.f32 %v699_v28, %v241_v9  ;;  %v146_v22 = vsub.f32 %v989_v8, %v109_v32  ;;  %v147_v29 = vsub.f32 %v991_v4, %v111_v38  ;;  %v705_v4 = vpop.eup %704 }
  0xcf   :  { %710 = vpow2.f32 %v310_v13 }
  0xd0   :  { %v553_v41 = vsel %vm537_vm3, %v320_v39, 0.0  ;;  %v242_v42 = vand.u32 2147483647, %v146_v22  ;;  %v243_v46 = vand.u32 2147483647, %v147_v29  ;;  %v555_v24 = vsel %vm537_vm3, %v321_v15, 0.0 }
  0xd1   :  { %v554_v50 = vadd.f32 %v553_v41, %v552_v25  ;;  %v113_v10 = vpop.permute.xlu0 %112  ;;  %v115_v47 = vpop.permute.xlu1 %114 }
  0xd2   :  { %v322_v53 = vmul.f32 %v701_v40, %v242_v42  ;;  %v323_v54 = vmul.f32 %v703_v31, %v243_v46  ;;  %v148_v55 = vsub.f32 %v1002_v36, %v113_v10  ;;  %v149_v8 = vsub.f32 %v1004_v37, %v115_v47  ;;  %v707_v52 = vpop.eup %706 }
  0xd3   :  { %v556_v51 = vadd.f32 %v555_v24, %v554_v50 }
  0xd4   :  { %v557_v33 = vsel %vm537_vm3, %v322_v53, 0.0  ;;  %v244_v60 = vand.u32 2147483647, %v148_v55  ;;  %v245_v61 = vand.u32 2147483647, %v149_v8  ;;  %v559_v62 = vsel %vm537_vm3, %v323_v54, 0.0 }
  0xd5   :  { %v558_v43 = vadd.f32 %v557_v33, %v556_v51  ;;  %v117_v34 = vpop.permute.xlu0 %116  ;;  %v119_v35 = vpop.permute.xlu1 %118 }
  0xd6   :  { %v324_v63 = vmul.f32 %v705_v4, %v244_v60  ;;  %v325_v7 = vmul.f32 %v707_v52, %v245_v61  ;;  %v150_v48 = vsub.f32 %v1014_v56, %v117_v34  ;;  %v151_v36 = vsub.f32 %v1016_v58, %v119_v35  ;;  %v709_v57 = vpop.eup %708 }
  0xd7   :  { %v560_v37 = vadd.f32 %v559_v62, %v558_v43 }
  0xd8   :  { %v561_v5 = vsel %vm537_vm3, %v324_v63, 0.0  ;;  %v246_v59 = vand.u32 2147483647, %v150_v48  ;;  %v247_v1 = vand.u32 2147483647, %v151_v36  ;;  %v563_v44 = vsel %vm537_vm3, %v325_v7, 0.0 }
  0xd9   :  { %v711_v11 = vpop.eup %710  ;;  %v562_v6 = vadd.f32 %v561_v5, %v560_v37 }
  0xda   :  { %v326_v12 = vmul.f32 %v709_v57, %v246_v59  ;;  %v327_v16 = vmul.f32 %v711_v11, %v247_v1 }
  0xdb   :  { %v564_v3 = vadd.f32 %v563_v44, %v562_v6 }
  0xdc   :  { %v565_v17 = vsel %vm537_vm3, %v326_v12, 0.0  ;;  %v567_v18 = vsel %vm537_vm3, %v327_v16, 0.0 }
  0xdd   :  { %v566_v56 = vadd.f32 %v565_v17, %v564_v3 }
  0xdf   :  { %v568_v0 = vadd.f32 %v567_v18, %v566_v56 }
  0xe1   :  { %569 = vadd.xlane.f32.xlu0 %v568_v0 }
 0x114   :  { %v612_v58 = vpop.xlane.xlu1 %611 }
 0x115   :  { %v613_v19 = vrot.slane %v612_v58, 4 }
 0x117   :  { %v614_v45 = vadd.f32 %v613_v19, %v612_v58 }
 0x119   :  { %v615_v2 = vrot.slane %v614_v45, 2 }
 0x11b   :  { %v616_v21 = vadd.f32 %v615_v2, %v614_v45 }
 0x11d   :  { %v617_v26 = vrot.slane %v616_v21, 1 }
 0x11f   :  { %v618_v30 = vadd.f32 %v617_v26, %v616_v21 }
 0x16e   :  { %v570_v49 = vpop.xlane.xlu0 %569 }
 0x16f   :  { %v571_v27 = vrot.slane %v570_v49, 4 }
 0x171   :  { %v572_v20 = vadd.f32 %v571_v27, %v570_v49 }
 0x173   :  { %v573_v23 = vrot.slane %v572_v20, 2 }
 0x175   :  { %v574_v14 = vadd.f32 %v573_v23, %v572_v20 }
 0x177   :  { %v575_v9 = vrot.slane %v574_v14, 1 }
 0x179   :  { %v576_v28 = vadd.f32 %v575_v9, %v574_v14 }
 0x17b   :  { %638 = vpush %v576_v28 }
 0x17c   :  { %640 = vpush %v618_v30 }
 0x1ac   :  { %s639_s1 = spop %638 }
 0x1ad   :  { %s641_s7 = spop %640 }
 0x1ae   :  { %s620_s8 = sadd.f32 %s641_s7, %s639_s1 }
 0x1b0   :  { %622 = sst [smem:[#allocation7]] %s620_s8 }
 0x1b1   :  { %765 = shalt.err (!%p762_p4)
}
 0x1b2   :  { %s777_s16 = smov [#allocation7]  }
 0x1b3   :  { %630 = dma.smem_to_hbm %s777_s16, 16, %s1103_s2, [#allocation4]  }
 0x1b4   :  { %770 = dma.done.wait [#allocation4], 16  }
 0x1b5   :  { %771 = vsyncadd [#allocation4], 4294967280 }
 0x1b6   :  { %634 = sfence }
 0x1b7   :  { %635 = vsyncpa [#allocation3], 1 }
 0x1b8   :  { %636 = vsyncpa [#allocation6], 1 }
 0x1b9   :  { %637 = vsyncpa [#allocation4], 1 }

</bundles_post_ra>
